<compile_context>
chip_gen: v7x
topology: tpu7x:2x2x1
jax: 0.10.0
libtpu: 0.0.40
codegen_flags: <defaults>
</compile_context>

<pallas_src>
import functools

import jax
import jax.numpy as jnp
from jax.experimental import pallas as pl
from jax.experimental.pallas import tpu as pltpu


def _attention_coupling_kernel(x_ref, wqkv_ref, wu_ref, bu_ref, y_ref, *,
                               n_heads, head_dim, scale, causal_mask):
    """One batch element per grid step: y = x + (MHSA(x@Wqkv_pad) @ Wu_pad + bu_pad)."""
    x = x_ref[...]                                             # (T, C) f32
    T = x.shape[0]
    H = n_heads * head_dim

    # Fused QKV projection over the full (zero-padded) channel dim.
    qkv = jnp.dot(x, wqkv_ref[...], preferred_element_type=jnp.float32)   # (T, 3H)
    q = qkv[:, 0:H] * scale
    k = qkv[:, H:2 * H] * scale
    v = qkv[:, 2 * H:3 * H]

    # Accumulate unifyheads directly per head:
    #   unified = sum_h out_h @ Wu_pad[h*e:(h+1)*e, :] + bu_pad
    acc = jnp.broadcast_to(bu_ref[...], (T, x.shape[1]))       # (T, C), zeros in x1 cols

    for h in range(n_heads):                                   # small static head loop
        lo, hi = h * head_dim, (h + 1) * head_dim
        qh, kh, vh = q[:, lo:hi], k[:, lo:hi], v[:, lo:hi]     # (T, e)

        # scores = qh @ kh^T  (contract head dim, no explicit transpose)
        s = jax.lax.dot_general(qh, kh, (((1,), (1,)), ((), ())),
                                preferred_element_type=jnp.float32)       # (T, T)
        if causal_mask:  # matches mask_(..., mask_diagonal=False): mask j > i
            rows = jax.lax.broadcasted_iota(jnp.int32, (T, T), 0)
            cols = jax.lax.broadcasted_iota(jnp.int32, (T, T), 1)
            s = jnp.where(cols > rows, -jnp.inf, s)

        # softmax over keys (exact divide so we match the f32 reference tightly)
        s = s - jnp.max(s, axis=-1, keepdims=True)
        p = jnp.exp(s)
        p = p / jnp.sum(p, axis=-1, keepdims=True)

        oh = jnp.dot(p, vh, preferred_element_type=jnp.float32)           # (T, e)
        acc = acc + jnp.dot(oh, wu_ref[lo:hi, :],
                            preferred_element_type=jnp.float32)           # (T, C)

    y_ref[...] = (x + acc).astype(y_ref.dtype)


def self_attention_coupling_forward(x, params, *, n_heads, mask=False):
    """x: [B, T, C] f32.  params: wq/wk/wv (e, H), wu (H, d2), bu (d2,)."""
    B, T, C = x.shape
    d1 = C // 2
    d2 = C - d1
    e = d1
    H = n_heads * e
    scale = 1.0 / float(e) ** 0.25      # applied to q AND k, like the reference

    f32 = jnp.float32
    # Zero-pad projection weights (e, H) -> (C, H): x @ Wpad == x1 @ W.
    zpad_rows = jnp.zeros((C - d1, H), f32)
    wqkv = jnp.concatenate(
        [jnp.concatenate([params["wq"].astype(f32), zpad_rows], axis=0),
         jnp.concatenate([params["wk"].astype(f32), zpad_rows], axis=0),
         jnp.concatenate([params["wv"].astype(f32), zpad_rows], axis=0)],
        axis=1)                                                    # (C, 3H)
    # Zero-pad unifyheads output (H, d2) -> (H, C) and bias (d2,) -> (1, C).
    wu = jnp.concatenate([jnp.zeros((H, d1), f32),
                          params["wu"].astype(f32)], axis=1)       # (H, C)
    bu = jnp.concatenate([jnp.zeros((d1,), f32),
                          params["bu"].astype(f32)], axis=0).reshape(1, C)

    kernel = functools.partial(_attention_coupling_kernel,
                               n_heads=n_heads, head_dim=e,
                               scale=scale, causal_mask=bool(mask))

    y = pl.pallas_call(
        kernel,
        out_shape=jax.ShapeDtypeStruct((B, T, C), x.dtype),
        grid_spec=pltpu.PrefetchScalarGridSpec(
            num_scalar_prefetch=0,
            grid=(B,),                                            # one batch / step
            in_specs=[
                pl.BlockSpec((None, T, C), lambda b: (b, 0, 0)),  # x (batch squeezed)
                pl.BlockSpec((C, 3 * H), lambda b: (0, 0)),       # fused QKV weights (resident)
                pl.BlockSpec((H, C), lambda b: (0, 0)),           # unifyheads weights (resident)
                pl.BlockSpec((1, C), lambda b: (0, 0)),           # padded bias (resident)
            ],
            out_specs=pl.BlockSpec((None, T, C), lambda b: (b, 0, 0)),
        ),
        compiler_params=pltpu.CompilerParams(
            dimension_semantics=("parallel",),                    # 2-TC sharding on v7x
            vmem_limit_bytes=32 * 1024 * 1024,                    # safe on v5e/v6e/v7x
        ),
    )(x, wqkv, wu, bu)
    return y


def init_params(key, d1, n_heads, d2, dtype=jnp.float32):
    """Deterministic init mirroring the PyTorch Linear layers (stored as (in, out))."""
    H = d1 * n_heads
    kq, kk, kv, ku, kb = jax.random.split(key, 5)
    s_in = 1.0 / float(d1) ** 0.5
    s_u = 1.0 / float(H) ** 0.5
    return {
        "wq": jax.random.uniform(kq, (d1, H), dtype, -s_in, s_in),
        "wk": jax.random.uniform(kk, (d1, H), dtype, -s_in, s_in),
        "wv": jax.random.uniform(kv, (d1, H), dtype, -s_in, s_in),
        "wu": jax.random.uniform(ku, (H, d2), dtype, -s_u, s_u),
        "bu": jax.random.uniform(kb, (d2,), dtype, -s_u, s_u),
    }


def reference_forward(x, params, *, n_heads, mask=False):
    """Pure-JAX transcription of the PyTorch module forward (rev=False, c=[])."""
    B, T, C = x.shape
    d1 = C // 2
    e = d1
    x1, x2 = x[..., :d1], x[..., d1:]
    q = (x1 @ params["wq"]).reshape(B, T, n_heads, e).transpose(0, 2, 1, 3)
    k = (x1 @ params["wk"]).reshape(B, T, n_heads, e).transpose(0, 2, 1, 3)
    v = (x1 @ params["wv"]).reshape(B, T, n_heads, e).transpose(0, 2, 1, 3)
    q = q / float(e) ** 0.25
    k = k / float(e) ** 0.25
    dot = jnp.einsum("bhte,bhse->bhts", q, k)
    if mask:
        rows = jnp.arange(T)[:, None]
        cols = jnp.arange(T)[None, :]
        dot = jnp.where(cols > rows, -jnp.inf, dot)
    p = jax.nn.softmax(dot, axis=-1)
    out = jnp.einsum("bhts,bhse->bhte", p, v)                     # (B, h, T, e)
    out = out.transpose(0, 2, 1, 3).reshape(B, T, n_heads * e)
    unified = out @ params["wu"] + params["bu"]
    return jnp.concatenate([x1, x2 + unified], axis=-1)


if __name__ == "__main__":
    key = jax.random.PRNGKey(0)
    kx, kp = jax.random.split(key)

    B, T, C = 2, 8, 4          # batch, tokens, embedding channels
    n_heads = 8                # module default
    d1 = C // 2
    d2 = C - d1

    x = jax.random.normal(kx, (B, T, C), dtype=jnp.float32)
    params = init_params(kp, d1, n_heads, d2)

    fwd = jax.jit(lambda xx, pp: self_attention_coupling_forward(
        xx, pp, n_heads=n_heads, mask=False))
    y = jax.block_until_ready(fwd(x, params))

    y_ref = reference_forward(x, params, n_heads=n_heads, mask=False)
    assert y.shape == x.shape
    assert jnp.allclose(y, y_ref, atol=1e-5, rtol=1e-5), "mismatch vs reference"
    # x1 half must be a pure pass-through.
    assert jnp.allclose(y[..., :d1], x[..., :d1]), "x1 pass-through violated"

    print("KERNEL_OK")
</pallas_src>

<mosaic_0001>
module attributes {stable_mosaic.version = 11 : i64} {
  func.func @_attention_coupling_kernel(%arg0: i32, %arg1: memref<1x8x4xf32, #tpu.memory_space<vmem>>, %arg2: memref<4x48xf32, #tpu.memory_space<vmem>>, %arg3: memref<16x4xf32, #tpu.memory_space<vmem>>, %arg4: memref<1x4xf32, #tpu.memory_space<vmem>>, %arg5: memref<1x8x4xf32, #tpu.memory_space<vmem>>) attributes {dimension_semantics = [#tpu.dimension_semantics<parallel>], iteration_bounds = array<i64: 2>, scalar_prefetch = 0 : i64, scratch_operands = 0 : i64, tpu.core_type = #tpu.core_type<tc>, window_params = [{transform_indices = @transform_0, window_bounds = array<i64: 1, 8, 4>}, {pipeline_mode = #tpu.pipeline_mode<synchronous>, transform_indices = @transform_1, window_bounds = array<i64: 4, 48>}, {pipeline_mode = #tpu.pipeline_mode<synchronous>, transform_indices = @transform_2, window_bounds = array<i64: 16, 4>}, {pipeline_mode = #tpu.pipeline_mode<synchronous>, transform_indices = @transform_3, window_bounds = array<i64: 1, 4>}, {transform_indices = @transform_4, window_bounds = array<i64: 1, 8, 4>}]} {
    %c0 = arith.constant 0 : index
    %c0_0 = arith.constant 0 : index
    %c0_1 = arith.constant 0 : index
    %0 = vector.load %arg1[%c0, %c0_0, %c0_1] : memref<1x8x4xf32, #tpu.memory_space<vmem>>, vector<1x8x4xf32>
    %1 = vector.shape_cast %0 : vector<1x8x4xf32> to vector<8x4xf32>
    %c0_2 = arith.constant 0 : index
    %c0_3 = arith.constant 0 : index
    %2 = vector.load %arg2[%c0_2, %c0_3] : memref<4x48xf32, #tpu.memory_space<vmem>>, vector<4x48xf32>
    %cst = arith.constant dense<0.000000e+00> : vector<8x48xf32>
    %3 = tpu.matmul %1, %2, %cst {dimension_numbers = #tpu.dot_dimension_numbers<[1], [0], [0], [1], [0, 0, 1, 1], [], []>} : vector<8x4xf32>, vector<4x48xf32>, vector<8x48xf32> -> vector<8x48xf32>
    %4 = vector.extract_strided_slice %3 {offsets = [0, 0], sizes = [8, 16], strides = [1, 1]} : vector<8x48xf32> to vector<8x16xf32>
    %cst_4 = arith.constant 0.840896427 : f32
    %5 = vector.broadcast %cst_4 : f32 to vector<8x16xf32>
    %6 = arith.mulf %4, %5 : vector<8x16xf32>
    %7 = vector.extract_strided_slice %3 {offsets = [0, 16], sizes = [8, 16], strides = [1, 1]} : vector<8x48xf32> to vector<8x16xf32>
    %cst_5 = arith.constant 0.840896427 : f32
    %8 = vector.broadcast %cst_5 : f32 to vector<8x16xf32>
    %9 = arith.mulf %7, %8 : vector<8x16xf32>
    %10 = vector.extract_strided_slice %3 {offsets = [0, 32], sizes = [8, 16], strides = [1, 1]} : vector<8x48xf32> to vector<8x16xf32>
    %c0_6 = arith.constant 0 : index
    %c0_7 = arith.constant 0 : index
    %11 = vector.load %arg4[%c0_6, %c0_7] : memref<1x4xf32, #tpu.memory_space<vmem>>, vector<1x4xf32>
    %12 = vector.shape_cast %11 : vector<1x4xf32> to vector<1x4xf32>
    %13 = vector.broadcast %12 : vector<1x4xf32> to vector<8x4xf32>
    %14 = vector.extract_strided_slice %6 {offsets = [0, 0], sizes = [8, 2], strides = [1, 1]} : vector<8x16xf32> to vector<8x2xf32>
    %15 = vector.extract_strided_slice %9 {offsets = [0, 0], sizes = [8, 2], strides = [1, 1]} : vector<8x16xf32> to vector<8x2xf32>
    %16 = vector.extract_strided_slice %10 {offsets = [0, 0], sizes = [8, 2], strides = [1, 1]} : vector<8x16xf32> to vector<8x2xf32>
    %cst_8 = arith.constant dense<0.000000e+00> : vector<8x8xf32>
    %17 = tpu.matmul %14, %15, %cst_8 {dimension_numbers = #tpu.dot_dimension_numbers<[1], [1], [0], [0], [0, 0, 1, 0], [], []>} : vector<8x2xf32>, vector<8x2xf32>, vector<8x8xf32> -> vector<8x8xf32>
    %cst_9 = arith.constant dense<0xFF800000> : vector<8xf32>
    %18 = vector.multi_reduction <maximumf>, %17, %cst_9 [1] : vector<8x8xf32> to vector<8xf32>
    %19 = vector.shape_cast %18 : vector<8xf32> to vector<8x1xf32>
    %20 = vector.broadcast %19 : vector<8x1xf32> to vector<8x8xf32>
    %21 = arith.subf %17, %20 : vector<8x8xf32>
    %22 = math.exp %21 : vector<8x8xf32>
    %cst_10 = arith.constant dense<0.000000e+00> : vector<8xf32>
    %23 = vector.multi_reduction <add>, %22, %cst_10 [1] : vector<8x8xf32> to vector<8xf32>
    %24 = vector.shape_cast %23 : vector<8xf32> to vector<8x1xf32>
    %25 = vector.broadcast %24 : vector<8x1xf32> to vector<8x8xf32>
    %26 = arith.divf %22, %25 : vector<8x8xf32>
    %cst_11 = arith.constant dense<0.000000e+00> : vector<8x2xf32>
    %27 = tpu.matmul %26, %16, %cst_11 {dimension_numbers = #tpu.dot_dimension_numbers<[1], [0], [0], [1], [0, 0, 1, 1], [], []>} : vector<8x8xf32>, vector<8x2xf32>, vector<8x2xf32> -> vector<8x2xf32>
    %c0_12 = arith.constant 0 : index
    %c0_13 = arith.constant 0 : index
    %28 = vector.load %arg3[%c0_12, %c0_13] : memref<16x4xf32, #tpu.memory_space<vmem>>, vector<2x4xf32>
    %cst_14 = arith.constant dense<0.000000e+00> : vector<8x4xf32>
    %29 = tpu.matmul %27, %28, %cst_14 {dimension_numbers = #tpu.dot_dimension_numbers<[1], [0], [0], [1], [0, 0, 1, 1], [], []>} : vector<8x2xf32>, vector<2x4xf32>, vector<8x4xf32> -> vector<8x4xf32>
    %30 = arith.addf %13, %29 : vector<8x4xf32>
    %31 = vector.extract_strided_slice %6 {offsets = [0, 2], sizes = [8, 2], strides = [1, 1]} : vector<8x16xf32> to vector<8x2xf32>
    %32 = vector.extract_strided_slice %9 {offsets = [0, 2], sizes = [8, 2], strides = [1, 1]} : vector<8x16xf32> to vector<8x2xf32>
    %33 = vector.extract_strided_slice %10 {offsets = [0, 2], sizes = [8, 2], strides = [1, 1]} : vector<8x16xf32> to vector<8x2xf32>
    %cst_15 = arith.constant dense<0.000000e+00> : vector<8x8xf32>
    %34 = tpu.matmul %31, %32, %cst_15 {dimension_numbers = #tpu.dot_dimension_numbers<[1], [1], [0], [0], [0, 0, 1, 0], [], []>} : vector<8x2xf32>, vector<8x2xf32>, vector<8x8xf32> -> vector<8x8xf32>
    %cst_16 = arith.constant dense<0xFF800000> : vector<8xf32>
    %35 = vector.multi_reduction <maximumf>, %34, %cst_16 [1] : vector<8x8xf32> to vector<8xf32>
    %36 = vector.shape_cast %35 : vector<8xf32> to vector<8x1xf32>
    %37 = vector.broadcast %36 : vector<8x1xf32> to vector<8x8xf32>
    %38 = arith.subf %34, %37 : vector<8x8xf32>
    %39 = math.exp %38 : vector<8x8xf32>
    %cst_17 = arith.constant dense<0.000000e+00> : vector<8xf32>
    %40 = vector.multi_reduction <add>, %39, %cst_17 [1] : vector<8x8xf32> to vector<8xf32>
    %41 = vector.shape_cast %40 : vector<8xf32> to vector<8x1xf32>
    %42 = vector.broadcast %41 : vector<8x1xf32> to vector<8x8xf32>
    %43 = arith.divf %39, %42 : vector<8x8xf32>
    %cst_18 = arith.constant dense<0.000000e+00> : vector<8x2xf32>
    %44 = tpu.matmul %43, %33, %cst_18 {dimension_numbers = #tpu.dot_dimension_numbers<[1], [0], [0], [1], [0, 0, 1, 1], [], []>} : vector<8x8xf32>, vector<8x2xf32>, vector<8x2xf32> -> vector<8x2xf32>
    %c2 = arith.constant 2 : index
    %c0_19 = arith.constant 0 : index
    %45 = vector.load %arg3[%c2, %c0_19] : memref<16x4xf32, #tpu.memory_space<vmem>>, vector<2x4xf32>
    %cst_20 = arith.constant dense<0.000000e+00> : vector<8x4xf32>
    %46 = tpu.matmul %44, %45, %cst_20 {dimension_numbers = #tpu.dot_dimension_numbers<[1], [0], [0], [1], [0, 0, 1, 1], [], []>} : vector<8x2xf32>, vector<2x4xf32>, vector<8x4xf32> -> vector<8x4xf32>
    %47 = arith.addf %30, %46 : vector<8x4xf32>
    %48 = vector.extract_strided_slice %6 {offsets = [0, 4], sizes = [8, 2], strides = [1, 1]} : vector<8x16xf32> to vector<8x2xf32>
    %49 = vector.extract_strided_slice %9 {offsets = [0, 4], sizes = [8, 2], strides = [1, 1]} : vector<8x16xf32> to vector<8x2xf32>
    %50 = vector.extract_strided_slice %10 {offsets = [0, 4], sizes = [8, 2], strides = [1, 1]} : vector<8x16xf32> to vector<8x2xf32>
    %cst_21 = arith.constant dense<0.000000e+00> : vector<8x8xf32>
    %51 = tpu.matmul %48, %49, %cst_21 {dimension_numbers = #tpu.dot_dimension_numbers<[1], [1], [0], [0], [0, 0, 1, 0], [], []>} : vector<8x2xf32>, vector<8x2xf32>, vector<8x8xf32> -> vector<8x8xf32>
    %cst_22 = arith.constant dense<0xFF800000> : vector<8xf32>
    %52 = vector.multi_reduction <maximumf>, %51, %cst_22 [1] : vector<8x8xf32> to vector<8xf32>
    %53 = vector.shape_cast %52 : vector<8xf32> to vector<8x1xf32>
    %54 = vector.broadcast %53 : vector<8x1xf32> to vector<8x8xf32>
    %55 = arith.subf %51, %54 : vector<8x8xf32>
    %56 = math.exp %55 : vector<8x8xf32>
    %cst_23 = arith.constant dense<0.000000e+00> : vector<8xf32>
    %57 = vector.multi_reduction <add>, %56, %cst_23 [1] : vector<8x8xf32> to vector<8xf32>
    %58 = vector.shape_cast %57 : vector<8xf32> to vector<8x1xf32>
    %59 = vector.broadcast %58 : vector<8x1xf32> to vector<8x8xf32>
    %60 = arith.divf %56, %59 : vector<8x8xf32>
    %cst_24 = arith.constant dense<0.000000e+00> : vector<8x2xf32>
    %61 = tpu.matmul %60, %50, %cst_24 {dimension_numbers = #tpu.dot_dimension_numbers<[1], [0], [0], [1], [0, 0, 1, 1], [], []>} : vector<8x8xf32>, vector<8x2xf32>, vector<8x2xf32> -> vector<8x2xf32>
    %c4 = arith.constant 4 : index
    %c0_25 = arith.constant 0 : index
    %62 = vector.load %arg3[%c4, %c0_25] : memref<16x4xf32, #tpu.memory_space<vmem>>, vector<2x4xf32>
    %cst_26 = arith.constant dense<0.000000e+00> : vector<8x4xf32>
    %63 = tpu.matmul %61, %62, %cst_26 {dimension_numbers = #tpu.dot_dimension_numbers<[1], [0], [0], [1], [0, 0, 1, 1], [], []>} : vector<8x2xf32>, vector<2x4xf32>, vector<8x4xf32> -> vector<8x4xf32>
    %64 = arith.addf %47, %63 : vector<8x4xf32>
    %65 = vector.extract_strided_slice %6 {offsets = [0, 6], sizes = [8, 2], strides = [1, 1]} : vector<8x16xf32> to vector<8x2xf32>
    %66 = vector.extract_strided_slice %9 {offsets = [0, 6], sizes = [8, 2], strides = [1, 1]} : vector<8x16xf32> to vector<8x2xf32>
    %67 = vector.extract_strided_slice %10 {offsets = [0, 6], sizes = [8, 2], strides = [1, 1]} : vector<8x16xf32> to vector<8x2xf32>
    %cst_27 = arith.constant dense<0.000000e+00> : vector<8x8xf32>
    %68 = tpu.matmul %65, %66, %cst_27 {dimension_numbers = #tpu.dot_dimension_numbers<[1], [1], [0], [0], [0, 0, 1, 0], [], []>} : vector<8x2xf32>, vector<8x2xf32>, vector<8x8xf32> -> vector<8x8xf32>
    %cst_28 = arith.constant dense<0xFF800000> : vector<8xf32>
    %69 = vector.multi_reduction <maximumf>, %68, %cst_28 [1] : vector<8x8xf32> to vector<8xf32>
    %70 = vector.shape_cast %69 : vector<8xf32> to vector<8x1xf32>
    %71 = vector.broadcast %70 : vector<8x1xf32> to vector<8x8xf32>
    %72 = arith.subf %68, %71 : vector<8x8xf32>
    %73 = math.exp %72 : vector<8x8xf32>
    %cst_29 = arith.constant dense<0.000000e+00> : vector<8xf32>
    %74 = vector.multi_reduction <add>, %73, %cst_29 [1] : vector<8x8xf32> to vector<8xf32>
    %75 = vector.shape_cast %74 : vector<8xf32> to vector<8x1xf32>
    %76 = vector.broadcast %75 : vector<8x1xf32> to vector<8x8xf32>
    %77 = arith.divf %73, %76 : vector<8x8xf32>
    %cst_30 = arith.constant dense<0.000000e+00> : vector<8x2xf32>
    %78 = tpu.matmul %77, %67, %cst_30 {dimension_numbers = #tpu.dot_dimension_numbers<[1], [0], [0], [1], [0, 0, 1, 1], [], []>} : vector<8x8xf32>, vector<8x2xf32>, vector<8x2xf32> -> vector<8x2xf32>
    %c6 = arith.constant 6 : index
    %c0_31 = arith.constant 0 : index
    %79 = vector.load %arg3[%c6, %c0_31] : memref<16x4xf32, #tpu.memory_space<vmem>>, vector<2x4xf32>
    %cst_32 = arith.constant dense<0.000000e+00> : vector<8x4xf32>
    %80 = tpu.matmul %78, %79, %cst_32 {dimension_numbers = #tpu.dot_dimension_numbers<[1], [0], [0], [1], [0, 0, 1, 1], [], []>} : vector<8x2xf32>, vector<2x4xf32>, vector<8x4xf32> -> vector<8x4xf32>
    %81 = arith.addf %64, %80 : vector<8x4xf32>
    %82 = vector.extract_strided_slice %6 {offsets = [0, 8], sizes = [8, 2], strides = [1, 1]} : vector<8x16xf32> to vector<8x2xf32>
    %83 = vector.extract_strided_slice %9 {offsets = [0, 8], sizes = [8, 2], strides = [1, 1]} : vector<8x16xf32> to vector<8x2xf32>
    %84 = vector.extract_strided_slice %10 {offsets = [0, 8], sizes = [8, 2], strides = [1, 1]} : vector<8x16xf32> to vector<8x2xf32>
    %cst_33 = arith.constant dense<0.000000e+00> : vector<8x8xf32>
    %85 = tpu.matmul %82, %83, %cst_33 {dimension_numbers = #tpu.dot_dimension_numbers<[1], [1], [0], [0], [0, 0, 1, 0], [], []>} : vector<8x2xf32>, vector<8x2xf32>, vector<8x8xf32> -> vector<8x8xf32>
    %cst_34 = arith.constant dense<0xFF800000> : vector<8xf32>
    %86 = vector.multi_reduction <maximumf>, %85, %cst_34 [1] : vector<8x8xf32> to vector<8xf32>
    %87 = vector.shape_cast %86 : vector<8xf32> to vector<8x1xf32>
    %88 = vector.broadcast %87 : vector<8x1xf32> to vector<8x8xf32>
    %89 = arith.subf %85, %88 : vector<8x8xf32>
    %90 = math.exp %89 : vector<8x8xf32>
    %cst_35 = arith.constant dense<0.000000e+00> : vector<8xf32>
    %91 = vector.multi_reduction <add>, %90, %cst_35 [1] : vector<8x8xf32> to vector<8xf32>
    %92 = vector.shape_cast %91 : vector<8xf32> to vector<8x1xf32>
    %93 = vector.broadcast %92 : vector<8x1xf32> to vector<8x8xf32>
    %94 = arith.divf %90, %93 : vector<8x8xf32>
    %cst_36 = arith.constant dense<0.000000e+00> : vector<8x2xf32>
    %95 = tpu.matmul %94, %84, %cst_36 {dimension_numbers = #tpu.dot_dimension_numbers<[1], [0], [0], [1], [0, 0, 1, 1], [], []>} : vector<8x8xf32>, vector<8x2xf32>, vector<8x2xf32> -> vector<8x2xf32>
    %c8 = arith.constant 8 : index
    %c0_37 = arith.constant 0 : index
    %96 = vector.load %arg3[%c8, %c0_37] : memref<16x4xf32, #tpu.memory_space<vmem>>, vector<2x4xf32>
    %cst_38 = arith.constant dense<0.000000e+00> : vector<8x4xf32>
    %97 = tpu.matmul %95, %96, %cst_38 {dimension_numbers = #tpu.dot_dimension_numbers<[1], [0], [0], [1], [0, 0, 1, 1], [], []>} : vector<8x2xf32>, vector<2x4xf32>, vector<8x4xf32> -> vector<8x4xf32>
    %98 = arith.addf %81, %97 : vector<8x4xf32>
    %99 = vector.extract_strided_slice %6 {offsets = [0, 10], sizes = [8, 2], strides = [1, 1]} : vector<8x16xf32> to vector<8x2xf32>
    %100 = vector.extract_strided_slice %9 {offsets = [0, 10], sizes = [8, 2], strides = [1, 1]} : vector<8x16xf32> to vector<8x2xf32>
    %101 = vector.extract_strided_slice %10 {offsets = [0, 10], sizes = [8, 2], strides = [1, 1]} : vector<8x16xf32> to vector<8x2xf32>
    %cst_39 = arith.constant dense<0.000000e+00> : vector<8x8xf32>
    %102 = tpu.matmul %99, %100, %cst_39 {dimension_numbers = #tpu.dot_dimension_numbers<[1], [1], [0], [0], [0, 0, 1, 0], [], []>} : vector<8x2xf32>, vector<8x2xf32>, vector<8x8xf32> -> vector<8x8xf32>
    %cst_40 = arith.constant dense<0xFF800000> : vector<8xf32>
    %103 = vector.multi_reduction <maximumf>, %102, %cst_40 [1] : vector<8x8xf32> to vector<8xf32>
    %104 = vector.shape_cast %103 : vector<8xf32> to vector<8x1xf32>
    %105 = vector.broadcast %104 : vector<8x1xf32> to vector<8x8xf32>
    %106 = arith.subf %102, %105 : vector<8x8xf32>
    %107 = math.exp %106 : vector<8x8xf32>
    %cst_41 = arith.constant dense<0.000000e+00> : vector<8xf32>
    %108 = vector.multi_reduction <add>, %107, %cst_41 [1] : vector<8x8xf32> to vector<8xf32>
    %109 = vector.shape_cast %108 : vector<8xf32> to vector<8x1xf32>
    %110 = vector.broadcast %109 : vector<8x1xf32> to vector<8x8xf32>
    %111 = arith.divf %107, %110 : vector<8x8xf32>
    %cst_42 = arith.constant dense<0.000000e+00> : vector<8x2xf32>
    %112 = tpu.matmul %111, %101, %cst_42 {dimension_numbers = #tpu.dot_dimension_numbers<[1], [0], [0], [1], [0, 0, 1, 1], [], []>} : vector<8x8xf32>, vector<8x2xf32>, vector<8x2xf32> -> vector<8x2xf32>
    %c10 = arith.constant 10 : index
    %c0_43 = arith.constant 0 : index
    %113 = vector.load %arg3[%c10, %c0_43] : memref<16x4xf32, #tpu.memory_space<vmem>>, vector<2x4xf32>
    %cst_44 = arith.constant dense<0.000000e+00> : vector<8x4xf32>
    %114 = tpu.matmul %112, %113, %cst_44 {dimension_numbers = #tpu.dot_dimension_numbers<[1], [0], [0], [1], [0, 0, 1, 1], [], []>} : vector<8x2xf32>, vector<2x4xf32>, vector<8x4xf32> -> vector<8x4xf32>
    %115 = arith.addf %98, %114 : vector<8x4xf32>
    %116 = vector.extract_strided_slice %6 {offsets = [0, 12], sizes = [8, 2], strides = [1, 1]} : vector<8x16xf32> to vector<8x2xf32>
    %117 = vector.extract_strided_slice %9 {offsets = [0, 12], sizes = [8, 2], strides = [1, 1]} : vector<8x16xf32> to vector<8x2xf32>
    %118 = vector.extract_strided_slice %10 {offsets = [0, 12], sizes = [8, 2], strides = [1, 1]} : vector<8x16xf32> to vector<8x2xf32>
    %cst_45 = arith.constant dense<0.000000e+00> : vector<8x8xf32>
    %119 = tpu.matmul %116, %117, %cst_45 {dimension_numbers = #tpu.dot_dimension_numbers<[1], [1], [0], [0], [0, 0, 1, 0], [], []>} : vector<8x2xf32>, vector<8x2xf32>, vector<8x8xf32> -> vector<8x8xf32>
    %cst_46 = arith.constant dense<0xFF800000> : vector<8xf32>
    %120 = vector.multi_reduction <maximumf>, %119, %cst_46 [1] : vector<8x8xf32> to vector<8xf32>
    %121 = vector.shape_cast %120 : vector<8xf32> to vector<8x1xf32>
    %122 = vector.broadcast %121 : vector<8x1xf32> to vector<8x8xf32>
    %123 = arith.subf %119, %122 : vector<8x8xf32>
    %124 = math.exp %123 : vector<8x8xf32>
    %cst_47 = arith.constant dense<0.000000e+00> : vector<8xf32>
    %125 = vector.multi_reduction <add>, %124, %cst_47 [1] : vector<8x8xf32> to vector<8xf32>
    %126 = vector.shape_cast %125 : vector<8xf32> to vector<8x1xf32>
    %127 = vector.broadcast %126 : vector<8x1xf32> to vector<8x8xf32>
    %128 = arith.divf %124, %127 : vector<8x8xf32>
    %cst_48 = arith.constant dense<0.000000e+00> : vector<8x2xf32>
    %129 = tpu.matmul %128, %118, %cst_48 {dimension_numbers = #tpu.dot_dimension_numbers<[1], [0], [0], [1], [0, 0, 1, 1], [], []>} : vector<8x8xf32>, vector<8x2xf32>, vector<8x2xf32> -> vector<8x2xf32>
    %c12 = arith.constant 12 : index
    %c0_49 = arith.constant 0 : index
    %130 = vector.load %arg3[%c12, %c0_49] : memref<16x4xf32, #tpu.memory_space<vmem>>, vector<2x4xf32>
    %cst_50 = arith.constant dense<0.000000e+00> : vector<8x4xf32>
    %131 = tpu.matmul %129, %130, %cst_50 {dimension_numbers = #tpu.dot_dimension_numbers<[1], [0], [0], [1], [0, 0, 1, 1], [], []>} : vector<8x2xf32>, vector<2x4xf32>, vector<8x4xf32> -> vector<8x4xf32>
    %132 = arith.addf %115, %131 : vector<8x4xf32>
    %133 = vector.extract_strided_slice %6 {offsets = [0, 14], sizes = [8, 2], strides = [1, 1]} : vector<8x16xf32> to vector<8x2xf32>
    %134 = vector.extract_strided_slice %9 {offsets = [0, 14], sizes = [8, 2], strides = [1, 1]} : vector<8x16xf32> to vector<8x2xf32>
    %135 = vector.extract_strided_slice %10 {offsets = [0, 14], sizes = [8, 2], strides = [1, 1]} : vector<8x16xf32> to vector<8x2xf32>
    %cst_51 = arith.constant dense<0.000000e+00> : vector<8x8xf32>
    %136 = tpu.matmul %133, %134, %cst_51 {dimension_numbers = #tpu.dot_dimension_numbers<[1], [1], [0], [0], [0, 0, 1, 0], [], []>} : vector<8x2xf32>, vector<8x2xf32>, vector<8x8xf32> -> vector<8x8xf32>
    %cst_52 = arith.constant dense<0xFF800000> : vector<8xf32>
    %137 = vector.multi_reduction <maximumf>, %136, %cst_52 [1] : vector<8x8xf32> to vector<8xf32>
    %138 = vector.shape_cast %137 : vector<8xf32> to vector<8x1xf32>
    %139 = vector.broadcast %138 : vector<8x1xf32> to vector<8x8xf32>
    %140 = arith.subf %136, %139 : vector<8x8xf32>
    %141 = math.exp %140 : vector<8x8xf32>
    %cst_53 = arith.constant dense<0.000000e+00> : vector<8xf32>
    %142 = vector.multi_reduction <add>, %141, %cst_53 [1] : vector<8x8xf32> to vector<8xf32>
    %143 = vector.shape_cast %142 : vector<8xf32> to vector<8x1xf32>
    %144 = vector.broadcast %143 : vector<8x1xf32> to vector<8x8xf32>
    %145 = arith.divf %141, %144 : vector<8x8xf32>
    %cst_54 = arith.constant dense<0.000000e+00> : vector<8x2xf32>
    %146 = tpu.matmul %145, %135, %cst_54 {dimension_numbers = #tpu.dot_dimension_numbers<[1], [0], [0], [1], [0, 0, 1, 1], [], []>} : vector<8x8xf32>, vector<8x2xf32>, vector<8x2xf32> -> vector<8x2xf32>
    %c14 = arith.constant 14 : index
    %c0_55 = arith.constant 0 : index
    %147 = vector.load %arg3[%c14, %c0_55] : memref<16x4xf32, #tpu.memory_space<vmem>>, vector<2x4xf32>
    %cst_56 = arith.constant dense<0.000000e+00> : vector<8x4xf32>
    %148 = tpu.matmul %146, %147, %cst_56 {dimension_numbers = #tpu.dot_dimension_numbers<[1], [0], [0], [1], [0, 0, 1, 1], [], []>} : vector<8x2xf32>, vector<2x4xf32>, vector<8x4xf32> -> vector<8x4xf32>
    %149 = arith.addf %132, %148 : vector<8x4xf32>
    %150 = arith.addf %1, %149 : vector<8x4xf32>
    %c0_57 = arith.constant 0 : index
    %c0_58 = arith.constant 0 : index
    %c0_59 = arith.constant 0 : index
    %151 = vector.load %arg5[%c0_57, %c0_58, %c0_59] : memref<1x8x4xf32, #tpu.memory_space<vmem>>, vector<1x8x4xf32>
    %152 = vector.shape_cast %151 : vector<1x8x4xf32> to vector<8x4xf32>
    %153 = vector.shape_cast %150 : vector<8x4xf32> to vector<1x8x4xf32>
    tpu.vector_store %arg5[%c0_57, %c0_58, %c0_59], %153 {strides = array<i32>} : memref<1x8x4xf32, #tpu.memory_space<vmem>>, vector<1x8x4xf32>,
    return
  }
  func.func @transform_0(%arg0: i32) -> (i32, i32, i32) {
    %c0_i32 = arith.constant 0 : i32
    %c0_i32_0 = arith.constant 0 : i32
    %c0_i32_1 = arith.constant 0 : i32
    return %arg0, %c0_i32, %c0_i32_0 : i32, i32, i32
  }
  func.func @transform_1(%arg0: i32) -> (i32, i32) {
    %c0_i32 = arith.constant 0 : i32
    %c0_i32_0 = arith.constant 0 : i32
    %c0_i32_1 = arith.constant 0 : i32
    return %c0_i32, %c0_i32_0 : i32, i32
  }
  func.func @transform_2(%arg0: i32) -> (i32, i32) {
    %c0_i32 = arith.constant 0 : i32
    %c0_i32_0 = arith.constant 0 : i32
    %c0_i32_1 = arith.constant 0 : i32
    return %c0_i32, %c0_i32_0 : i32, i32
  }
  func.func @transform_3(%arg0: i32) -> (i32, i32) {
    %c0_i32 = arith.constant 0 : i32
    %c0_i32_0 = arith.constant 0 : i32
    %c0_i32_1 = arith.constant 0 : i32
    return %c0_i32, %c0_i32_0 : i32, i32
  }
  func.func @transform_4(%arg0: i32) -> (i32, i32, i32) {
    %c0_i32 = arith.constant 0 : i32
    %c0_i32_0 = arith.constant 0 : i32
    %c0_i32_1 = arith.constant 0 : i32
    return %arg0, %c0_i32, %c0_i32_0 : i32, i32, i32
  }
}

</mosaic_0001>

<bundles_post_ra>
// kernel: _lambda_.1
= control target key start
LH: loop header
LB: loop body
LE: loop exit
PB: predicated region body
PF: predicated region fallthrough
CT: control target
= control target key end

     0   :  { %s2633_s15 = smov 0   ;;  %s2853_s0 = inlined_call_operand.vmem [shape: f32[2,8,4], index: 0, kind: input, shape index: {}]   ;;  %s2854_s1 = inlined_call_operand.vmem [shape: f32[4,48], index: 1, kind: input, shape index: {}]   ;;  %s2855_s2 = inlined_call_operand.vmem [shape: f32[16,4], index: 2, kind: input, shape index: {}]   ;;  %s2856_s3 = inlined_call_operand.vmem [shape: f32[1,4], index: 3, kind: input, shape index: {}]   ;;  %s2857_s4 = inlined_call_operand.vmem [shape: f32[2,8,4], index: 4, kind: output, shape index: {}]  }
   0x1 LB: > { %s2283_s16 = sadd.s32 4294967295, %s2581_s15   ;;  %p2287_p0 = scmp.ge.s32.totalorder %s2581_s15, 1  ;;  %s2581_s15 = sphi %s2633_s15, %s14_s15  }
   0x2   : > { %p161_p1 = scmp.lt.s32.totalorder %s2581_s15, 3 }
   0x4   : > { %p162_p2 = pnand %p2287_p0, %p161_p1 }
   0x5   : > { %v194_v0 = vld [vmem:[%s2854_s1] sm:$0xf] (!%p162_p2)  ;;  %vm199_vm0 = vcmask (!%p162_p2), 1043456   ;;  %p185_p3 = scmp.lt.s32.totalorder (!%p162_p2), %s2283_s16, 1  ;;  %v2583_v1 = vmov (!%p162_p2), 0.0   ;;  %vm2584_vm1 = vmmov (!%p162_p2), 0  }
   0x6   : > { %165 = sbr.rel (%p162_p2) target bundleno = 5014 (0x1396), region = 36  ;;  %2385 = vmatprep.subr.mxu0 (!%p162_p2), %v2583_v1  ;;  %2387 = vmatprep.mubr.msk.f32.mxu0 (!%p162_p2), %vm2584_vm1, %v2583_v1  ;;  %vm195_vm2 = vcmask (!%p162_p2), 31744   ;;  %s2585_s23 = smov (!%p162_p2), 96   ;;  %vm284_vm3 = vcmask (!%p162_p2), 15360   ;;  %vm359_vm4 = vcmask (!%p162_p2), 64512   ;;  %vm452_vm5 = vcmask (!%p162_p2), 1041408  }
   0x7   : > { %2386 = vmatpush3.msk.msra.mxu0 (!%p162_p2), %vm199_vm0, %v194_v0  ;;  %2390 = vmatprep.subr.mxu1 (!%p162_p2), %v2583_v1  ;;  %s2586_s24 = smov (!%p162_p2), 112   ;;  %s2587_s25 = smov (!%p162_p2), 110   ;;  %v448_v16 = vld [vmem:[%s2855_s2] sm:$0x3] (!%p162_p2)  ;;  %v692_v40 = vld [vmem:[%s2855_s2 + $0x2] sm:$0x3] (!%p162_p2) }
   0x8   : > { %2395 = vmatprep.subr.mxu0 (!%p162_p2), %v2583_v1  ;;  %2392 = vmatprep.mubr.msk.f32.mxu1 (!%p162_p2), %vm2584_vm1, %v2583_v1  ;;  %s2588_s26 = smov (!%p162_p2), 94   ;;  %s2589_s27 = smov (!%p162_p2), 108   ;;  %v935_v52 = vld [vmem:[%s2855_s2 + $0x4] sm:$0x3] (!%p162_p2)  ;;  %v2292_v53 = vld [vmem:[%s2856_s3] ss:$0 sm:$0xff] (!%p162_p2) }
   0x9   : > { %s2590_s28 = smov (!%p162_p2), 126   ;;  %s2591_s5 = smov (!%p162_p2), 124  }
   0xa   : > { %s2592_s8 = smov (!%p162_p2), 92   ;;  %s2593_s9 = smov (!%p162_p2), 106  }
   0xb   : > { %s2594_s10 = smov (!%p162_p2), 122   ;;  %s2595_s11 = smov (!%p162_p2), 90  }
   0xc   : > { %s2596_s12 = smov (!%p162_p2), 104   ;;  %s2597_s20 = smov (!%p162_p2), 120  }
   0xd   : > { %s2859_s16 = smov (!%p185_p3, %s2283_s16), 1  ;;  %s2603_s30 = smov 116  }
   0xe   : > { %s2288_s19 = sshll.u32 %s2859_s16, 3  ;;  %s2604_s7 = smov 84  }
   0xf   : > { %s188_s22 = scalar_lea.vmem %s2853_s0, %s2288_s19 }
  0x10   : > { %v2659_v2 = vld [vmem:[%s188_s22] sm:$0xff] }
  0x11   : > { %2388 = vmatmul.mubr.msk.f32.vlgmr.msra.gmra.mrb[0].mxu0 %vm195_vm2, %v2659_v2 }
  0x12   : > { %2397 = vmatprep.mubr.msk.f32.mxu0 %vm2584_vm1, %v2583_v1 }
  0xe4   : > { %v2665_v3 = vpop.f32.mrb[0].mxu0 }
  0xe5   : > { %v2668_v4 = vmul.f32 0.8408964, %v2665_v3  ;;  %372 = vrot.lane.b32.xlu1 %v2665_v3, %s2585_s23  ;;  %v2389_v5 = vpop.f32.mrb[1].mxu0  ;;  %s2598_s23 = smov 88  }
  0xe7   : > { %282 = vrot.lane.b32.xlu0 %v2668_v4, %s2586_s24  ;;  %s2599_s24 = smov 102  }
  0xe9   : > { %529 = vrot.lane.b32.xlu1 %v2668_v4, %s2587_s25  ;;  %s2600_s25 = smov 118  }
 0x157   : > { %v373_v6 = vpop.permute.xlu1 %372 }
 0x158   : > { %2396 = vmatpush3.msra.mxu0 %v373_v6 }
 0x159   : > { %v283_v7 = vpop.permute.xlu0 %282  ;;  %2405 = vmatprep.subr.mxu0 %v2583_v1 }
 0x15a   : > { %2391 = vmatpush3.xpose.msk.msra.mxu1 %vm284_vm3, %v283_v7 }
 0x15b   : > { %2400 = vmatprep.subr.mxu1 %v2583_v1  ;;  %v530_v17 = vpop.permute.xlu1 %529 }
 0x15d   : > { %2393 = vmatmul.mubr.msk.f32.vlgmr.msra.gmra.mrb[0].mxu1 %vm284_vm3, %v2668_v4 }
 0x15e   : > { %2402 = vmatprep.mubr.msk.f32.mxu1 %vm2584_vm1, %v2583_v1  ;;  %2401 = vmatpush3.msk.msra.mxu1 %vm452_vm5, %v448_v16 }
 0x15f   : > { %2410 = vmatprep.subr.mxu1 %v2583_v1 }
 0x230   : > { %v355_v8 = vpop.f32.mrb[0].mxu1 }
 0x231   : > { %v2394_v9 = vpop.f32.mrb[1].mxu1  ;;  %v360_v10 = vsel %vm359_vm4, %v355_v8, -inf }
 0x232   : > { %361 = vmax.xlane.f32.xlu0 %v360_v10 }
 0x248   : > { %616 = vrot.lane.b32.xlu0 %v2665_v3, %s2588_s26  ;;  %s2601_s26 = smov 86  }
 0x24c   : > { %772 = vrot.lane.b32.xlu0 %v2668_v4, %s2589_s27  ;;  %s2602_s27 = smov 100  }
 0x2bf   : > { %v362_v11 = vpop.xlane.xlu0 %361 }
 0x2c0   : > { %v363_v12 = vsub.f32 %v355_v8, %v362_v11 }
 0x2c2   : > { %v364_v13 = vmul.f32 1.442695, %v363_v12 }
 0x2c3   : > { %v617_v23 = vpop.permute.xlu0 %616 }
 0x2c4   : > { %2543 = vpow2.f32 %v364_v13 }
 0x2c7   : > { %v773_v35 = vpop.permute.xlu0 %772 }
 0x2ce   : > { %v2544_v14 = vpop.eup %2543 }
 0x2cf   : > { %v366_v15 = vsel %vm359_vm4, %v2544_v14, 0.0 }
 0x2d0   : > { %367 = vadd.xlane.f32.xlu1 %v366_v15 }
 0x2e1   : > { %527 = vrot.lane.b32.xlu1 %v2668_v4, %s2590_s28 }
 0x35d   : > { %v368_v18 = vpop.xlane.xlu1 %367 }
 0x35e   : > { %2545 = vrcp.f32 %v368_v18 }
 0x361   : > { %v528_v21 = vpop.permute.xlu1 %527 }
 0x368   : > { %v2546_v19 = vpop.eup %2545 }
 0x369   : > { %v370_v20 = vmul.f32 %v2546_v19, %v2544_v14 }
 0x36b   : > { %2398 = vmatmul.mubr.msk.f32.vlgmr.msra.gmra.mrb[2].mxu0 %vm359_vm4, %v370_v20 }
 0x36c   : > { %2406 = vmatpush3.xpose.msk.msra.mxu0 %vm284_vm3, %v530_v17  ;;  %2407 = vmatprep.mubr.msk.f32.mxu0 %vm2584_vm1, %v2583_v1 }
 0x36d   : > { %2415 = vmatprep.subr.mxu0 %v2583_v1 }
 0x36f   : > { %2408 = vmatmul.mubr.msk.f32.vlgmr.msra.gmra.mrb[4].mxu0 %vm284_vm3, %v528_v21 }
 0x370   : > { %2417 = vmatprep.mubr.msk.f32.mxu0 %vm2584_vm1, %v2583_v1  ;;  %2416 = vmatpush3.msk.msra.mxu0 %vm452_vm5, %v692_v40 }
 0x371   : > { %2425 = vmatprep.subr.mxu0 %v2583_v1 }
 0x43e   : > { %v444_v22 = vpop.f32.mrb[2].mxu0 }
 0x43f   : > { %v2399_v24 = vpop.f32.mrb[3].mxu0  ;;  %2403 = vmatmul.mubr.msk.f32.vlgmr.msra.gmra.mrb[2].mxu1 %vm284_vm3, %v444_v22  ;;  %v1178_v22 = vld [vmem:[%s2855_s2 + $0x6] sm:$0x3] }
 0x440   : > { %2411 = vmatpush3.msra.mxu1 %v617_v23  ;;  %2412 = vmatprep.mubr.msk.f32.mxu1 %vm2584_vm1, %v2583_v1 }
 0x441   : > { %2420 = vmatprep.subr.mxu1 %v2583_v1 }
 0x442   : > { %v601_v25 = vpop.f32.mrb[4].mxu0 }
 0x443   : > { %v2409_v26 = vpop.f32.mrb[5].mxu0  ;;  %v605_v27 = vsel %vm359_vm4, %v601_v25, -inf }
 0x444   : > { %606 = vmax.xlane.f32.xlu1 %v605_v27 }
 0x4d1   : > { %v607_v28 = vpop.xlane.xlu1 %606 }
 0x4d2   : > { %v608_v29 = vsub.f32 %v601_v25, %v607_v28 }
 0x4d4   : > { %v609_v30 = vmul.f32 1.442695, %v608_v29 }
 0x4d6   : > { %2547 = vpow2.f32 %v609_v30 }
 0x4e0   : > { %v2548_v31 = vpop.eup %2547 }
 0x4e1   : > { %v611_v32 = vsel %vm359_vm4, %v2548_v31, 0.0 }
 0x4e2   : > { %612 = vadd.xlane.f32.xlu0 %v611_v32 }
 0x4f8   : > { %770 = vrot.lane.b32.xlu0 %v2668_v4, %s2591_s5 }
 0x512   : > { %v522_v33 = vpop.f32.mrb[2].mxu1 }
 0x513   : > { %v2404_v34 = vpop.f32.mrb[3].mxu1  ;;  %v526_v54 = vadd.f32 %v2292_v53, %v522_v33 }
 0x514   : > { %v1421_v34 = vld [vmem:[%s2855_s2 + $0x8] sm:$0x3] }
 0x56f   : > { %v613_v36 = vpop.xlane.xlu0 %612 }
 0x570   : > { %2549 = vrcp.f32 %v613_v36 }
 0x573   : > { %v771_v39 = vpop.permute.xlu0 %770 }
 0x57a   : > { %v2550_v37 = vpop.eup %2549 }
 0x57b   : > { %v615_v38 = vmul.f32 %v2550_v37, %v2548_v31 }
 0x57d   : > { %2413 = vmatmul.mubr.msk.f32.vlgmr.msra.gmra.mrb[4].mxu1 %vm359_vm4, %v615_v38 }
 0x57e   : > { %2421 = vmatpush3.xpose.msk.msra.mxu1 %vm284_vm3, %v773_v35  ;;  %2422 = vmatprep.mubr.msk.f32.mxu1 %vm2584_vm1, %v2583_v1 }
 0x57f   : > { %2430 = vmatprep.subr.mxu1 %v2583_v1 }
 0x581   : > { %2423 = vmatmul.mubr.msk.f32.vlgmr.msra.gmra.mrb[6].mxu1 %vm284_vm3, %v771_v39 }
 0x582   : > { %2432 = vmatprep.mubr.msk.f32.mxu1 %vm2584_vm1, %v2583_v1  ;;  %2431 = vmatpush3.msk.msra.mxu1 %vm452_vm5, %v935_v52 }
 0x583   : > { %2440 = vmatprep.subr.mxu1 %v2583_v1 }
 0x650   : > { %v688_v41 = vpop.f32.mrb[4].mxu1 }
 0x651   : > { %v2414_v42 = vpop.f32.mrb[5].mxu1  ;;  %2418 = vmatmul.mubr.msk.f32.vlgmr.msra.gmra.mrb[6].mxu0 %vm284_vm3, %v688_v41 }
 0x652   : > { %2427 = vmatprep.mubr.msk.f32.mxu0 %vm2584_vm1, %v2583_v1 }
 0x654   : > { %v844_v43 = vpop.f32.mrb[6].mxu1 }
 0x655   : > { %v2424_v44 = vpop.f32.mrb[7].mxu1  ;;  %v848_v45 = vsel %vm359_vm4, %v844_v43, -inf }
 0x656   : > { %849 = vmax.xlane.f32.xlu1 %v848_v45 }
 0x667   : > { %859 = vrot.lane.b32.xlu1 %v2665_v3, %s2592_s8  ;;  %s2605_s8 = smov 98  }
 0x66b   : > { %1015 = vrot.lane.b32.xlu1 %v2668_v4, %s2593_s9  ;;  %s2606_s9 = smov 114  }
 0x66f   : > { %1013 = vrot.lane.b32.xlu1 %v2668_v4, %s2594_s10 }
 0x6e3   : > { %v850_v46 = vpop.xlane.xlu1 %849 }
 0x6e4   : > { %v851_v47 = vsub.f32 %v844_v43, %v850_v46 }
 0x6e6   : > { %v852_v48 = vmul.f32 1.442695, %v851_v47 }
 0x6e7   : > { %v860_v49 = vpop.permute.xlu1 %859 }
 0x6e8   : > { %2551 = vpow2.f32 %v852_v48  ;;  %2426 = vmatpush3.msra.mxu0 %v860_v49 }
 0x6e9   : > { %2435 = vmatprep.subr.mxu0 %v2583_v1 }
 0x6eb   : > { %v1016_v60 = vpop.permute.xlu1 %1015 }
 0x6ef   : > { %v1014_v62 = vpop.permute.xlu1 %1013 }
 0x6f2   : > { %v2552_v50 = vpop.eup %2551 }
 0x6f3   : > { %v854_v51 = vsel %vm359_vm4, %v2552_v50, 0.0 }
 0x6f4   : > { %855 = vadd.xlane.f32.xlu0 %v854_v51 }
 0x70a   : > { %1102 = vrot.lane.b32.xlu0 %v2665_v3, %s2595_s11 }
 0x70e   : > { %1258 = vrot.lane.b32.xlu0 %v2668_v4, %s2596_s12  ;;  %s2607_s12 = smov 82  }
 0x724   : > { %v765_v55 = vpop.f32.mrb[6].mxu0 }
 0x725   : > { %v769_v56 = vadd.f32 %v765_v55, %v526_v54  ;;  %v2419_v57 = vpop.f32.mrb[7].mxu0 }
 0x781   : > { %v856_v58 = vpop.xlane.xlu0 %855 }
 0x782   : > { %2553 = vrcp.f32 %v856_v58 }
 0x785   : > { %v1103_v0 = vpop.permute.xlu0 %1102 }
 0x789   : > { %v1259_v17 = vpop.permute.xlu0 %1258 }
 0x78c   : > { %v2554_v59 = vpop.eup %2553 }
 0x78d   : > { %v858_v61 = vmul.f32 %v2554_v59, %v2552_v50 }
 0x78f   : > { %2428 = vmatmul.mubr.msk.f32.vlgmr.msra.gmra.mrb[8].mxu0 %vm359_vm4, %v858_v61 }
 0x790   : > { %2436 = vmatpush3.xpose.msk.msra.mxu0 %vm284_vm3, %v1016_v60  ;;  %2437 = vmatprep.mubr.msk.f32.mxu0 %vm2584_vm1, %v2583_v1 }
 0x791   : > { %2445 = vmatprep.subr.mxu0 %v2583_v1 }
 0x793   : > { %2438 = vmatmul.mubr.msk.f32.vlgmr.msra.gmra.mrb[10].mxu0 %vm284_vm3, %v1014_v62  ;;  %v1664_v62 = vld [vmem:[%s2855_s2 + $0xa] sm:$0x3] }
 0x794   : > { %2447 = vmatprep.mubr.msk.f32.mxu0 %vm2584_vm1, %v2583_v1  ;;  %2446 = vmatpush3.msk.msra.mxu0 %vm452_vm5, %v1178_v22 }
 0x795   : > { %2455 = vmatprep.subr.mxu0 %v2583_v1 }
 0x862   : > { %v931_v63 = vpop.f32.mrb[8].mxu0 }
 0x863   : > { %v2429_v5 = vpop.f32.mrb[9].mxu0  ;;  %2433 = vmatmul.mubr.msk.f32.vlgmr.msra.gmra.mrb[8].mxu1 %vm284_vm3, %v931_v63 }
 0x864   : > { %2441 = vmatpush3.msra.mxu1 %v1103_v0  ;;  %2442 = vmatprep.mubr.msk.f32.mxu1 %vm2584_vm1, %v2583_v1 }
 0x865   : > { %2450 = vmatprep.subr.mxu1 %v2583_v1 }
 0x866   : > { %v1087_v6 = vpop.f32.mrb[10].mxu0 }
 0x867   : > { %v2439_v7 = vpop.f32.mrb[11].mxu0  ;;  %v1091_v8 = vsel %vm359_vm4, %v1087_v6, -inf }
 0x868   : > { %1092 = vmax.xlane.f32.xlu1 %v1091_v8 }
 0x8f5   : > { %v1093_v9 = vpop.xlane.xlu1 %1092 }
 0x8f6   : > { %v1094_v10 = vsub.f32 %v1087_v6, %v1093_v9 }
 0x8f8   : > { %v1095_v11 = vmul.f32 1.442695, %v1094_v10 }
 0x8fa   : > { %2555 = vpow2.f32 %v1095_v11 }
 0x904   : > { %v2556_v12 = vpop.eup %2555 }
 0x905   : > { %v1097_v13 = vsel %vm359_vm4, %v2556_v12, 0.0 }
 0x906   : > { %1098 = vadd.xlane.f32.xlu0 %v1097_v13 }
 0x91c   : > { %1256 = vrot.lane.b32.xlu0 %v2668_v4, %s2597_s20  ;;  %s192_s20 = scalar_lea.vmem %s2857_s4, %s2288_s19 }
 0x936   : > { %v1008_v14 = vpop.f32.mrb[8].mxu1 }
 0x937   : > { %v1012_v15 = vadd.f32 %v1008_v14, %v769_v56  ;;  %v2434_v16 = vpop.f32.mrb[9].mxu1 }
 0x993   : > { %v1099_v18 = vpop.xlane.xlu0 %1098 }
 0x994   : > { %2557 = vrcp.f32 %v1099_v18 }
 0x997   : > { %v1257_v21 = vpop.permute.xlu0 %1256 }
 0x99e   : > { %v2558_v19 = vpop.eup %2557 }
 0x99f   : > { %v1101_v20 = vmul.f32 %v2558_v19, %v2556_v12 }
 0x9a1   : > { %2443 = vmatmul.mubr.msk.f32.vlgmr.msra.gmra.mrb[10].mxu1 %vm359_vm4, %v1101_v20 }
 0x9a2   : > { %2451 = vmatpush3.xpose.msk.msra.mxu1 %vm284_vm3, %v1259_v17  ;;  %2452 = vmatprep.mubr.msk.f32.mxu1 %vm2584_vm1, %v2583_v1 }
 0x9a3   : > { %2460 = vmatprep.subr.mxu1 %v2583_v1 }
 0x9a5   : > { %2453 = vmatmul.mubr.msk.f32.vlgmr.msra.gmra.mrb[12].mxu1 %vm284_vm3, %v1257_v21  ;;  %v1907_v21 = vld [vmem:[%s2855_s2 + $0xc] sm:$0x3] }
 0x9a6   : > { %2462 = vmatprep.mubr.msk.f32.mxu1 %vm2584_vm1, %v2583_v1  ;;  %2461 = vmatpush3.msk.msra.mxu1 %vm452_vm5, %v1421_v34 }
 0x9a7   : > { %2470 = vmatprep.subr.mxu1 %v2583_v1 }
 0xa74   : > { %v1174_v23 = vpop.f32.mrb[10].mxu1 }
 0xa75   : > { %v2444_v24 = vpop.f32.mrb[11].mxu1  ;;  %2448 = vmatmul.mubr.msk.f32.vlgmr.msra.gmra.mrb[12].mxu0 %vm284_vm3, %v1174_v23 }
 0xa76   : > { %2457 = vmatprep.mubr.msk.f32.mxu0 %vm2584_vm1, %v2583_v1 }
 0xa78   : > { %v1330_v25 = vpop.f32.mrb[12].mxu1 }
 0xa79   : > { %v2454_v26 = vpop.f32.mrb[13].mxu1  ;;  %v1334_v27 = vsel %vm359_vm4, %v1330_v25, -inf }
 0xa7a   : > { %1335 = vmax.xlane.f32.xlu1 %v1334_v27 }
 0xa8b   : > { %1345 = vrot.lane.b32.xlu1 %v2665_v3, %s2598_s23 }
 0xa8f   : > { %1501 = vrot.lane.b32.xlu1 %v2668_v4, %s2599_s24 }
 0xa93   : > { %1499 = vrot.lane.b32.xlu1 %v2668_v4, %s2600_s25 }
 0xb07   : > { %v1336_v28 = vpop.xlane.xlu1 %1335 }
 0xb08   : > { %v1337_v29 = vsub.f32 %v1330_v25, %v1336_v28 }
 0xb0a   : > { %v1338_v30 = vmul.f32 1.442695, %v1337_v29 }
 0xb0b   : > { %v1346_v31 = vpop.permute.xlu1 %1345 }
 0xb0c   : > { %2559 = vpow2.f32 %v1338_v30  ;;  %2456 = vmatpush3.msra.mxu0 %v1346_v31 }
 0xb0d   : > { %2465 = vmatprep.subr.mxu0 %v2583_v1 }
 0xb0f   : > { %v1502_v40 = vpop.permute.xlu1 %1501 }
 0xb13   : > { %v1500_v42 = vpop.permute.xlu1 %1499 }
 0xb16   : > { %v2560_v32 = vpop.eup %2559 }
 0xb17   : > { %v1340_v33 = vsel %vm359_vm4, %v2560_v32, 0.0 }
 0xb18   : > { %1341 = vadd.xlane.f32.xlu0 %v1340_v33 }
 0xb2e   : > { %1588 = vrot.lane.b32.xlu0 %v2665_v3, %s2601_s26 }
 0xb32   : > { %1744 = vrot.lane.b32.xlu0 %v2668_v4, %s2602_s27 }
 0xb48   : > { %v1251_v35 = vpop.f32.mrb[12].mxu0 }
 0xb49   : > { %v1255_v36 = vadd.f32 %v1251_v35, %v1012_v15  ;;  %v2449_v37 = vpop.f32.mrb[13].mxu0 }
 0xba5   : > { %v1342_v38 = vpop.xlane.xlu0 %1341 }
 0xba6   : > { %2561 = vrcp.f32 %v1342_v38 }
 0xba9   : > { %v1589_v44 = vpop.permute.xlu0 %1588 }
 0xbad   : > { %v1745_v57 = vpop.permute.xlu0 %1744 }
 0xbb0   : > { %v2562_v39 = vpop.eup %2561 }
 0xbb1   : > { %v1344_v41 = vmul.f32 %v2562_v39, %v2560_v32 }
 0xbb3   : > { %2458 = vmatmul.mubr.msk.f32.vlgmr.msra.gmra.mrb[14].mxu0 %vm359_vm4, %v1344_v41 }
 0xbb4   : > { %2466 = vmatpush3.xpose.msk.msra.mxu0 %vm284_vm3, %v1502_v40  ;;  %2467 = vmatprep.mubr.msk.f32.mxu0 %vm2584_vm1, %v2583_v1 }
 0xbb5   : > { %2475 = vmatprep.subr.mxu0 %v2583_v1 }
 0xbb7   : > { %2468 = vmatmul.mubr.msk.f32.vlgmr.msra.gmra.mrb[16].mxu0 %vm284_vm3, %v1500_v42 }
 0xbb8   : > { %2477 = vmatprep.mubr.msk.f32.mxu0 %vm2584_vm1, %v2583_v1  ;;  %2476 = vmatpush3.msk.msra.mxu0 %vm452_vm5, %v1664_v62 }
 0xbb9   : > { %2485 = vmatprep.subr.mxu0 %v2583_v1 }
 0xc86   : > { %v1417_v43 = vpop.f32.mrb[14].mxu0 }
 0xc87   : > { %v2459_v45 = vpop.f32.mrb[15].mxu0  ;;  %2463 = vmatmul.mubr.msk.f32.vlgmr.msra.gmra.mrb[14].mxu1 %vm284_vm3, %v1417_v43 }
 0xc88   : > { %2471 = vmatpush3.msra.mxu1 %v1589_v44  ;;  %2472 = vmatprep.mubr.msk.f32.mxu1 %vm2584_vm1, %v2583_v1 }
 0xc89   : > { %2480 = vmatprep.subr.mxu1 %v2583_v1 }
 0xc8a   : > { %v1573_v46 = vpop.f32.mrb[16].mxu0 }
 0xc8b   : > { %v2469_v47 = vpop.f32.mrb[17].mxu0  ;;  %v1577_v48 = vsel %vm359_vm4, %v1573_v46, -inf }
 0xc8c   : > { %1578 = vmax.xlane.f32.xlu1 %v1577_v48 }
 0xd19   : > { %v1579_v49 = vpop.xlane.xlu1 %1578 }
 0xd1a   : > { %v1580_v50 = vsub.f32 %v1573_v46, %v1579_v49 }
 0xd1c   : > { %v1581_v51 = vmul.f32 1.442695, %v1580_v50 }
 0xd1e   : > { %2563 = vpow2.f32 %v1581_v51 }
 0xd28   : > { %v2564_v52 = vpop.eup %2563 }
 0xd29   : > { %v1583_v53 = vsel %vm359_vm4, %v2564_v52, 0.0 }
 0xd2a   : > { %1584 = vadd.xlane.f32.xlu0 %v1583_v53 }
 0xd40   : > { %1742 = vrot.lane.b32.xlu0 %v2668_v4, %s2603_s30 }
 0xd5a   : > { %v1494_v54 = vpop.f32.mrb[14].mxu1 }
 0xd5b   : > { %v1498_v55 = vadd.f32 %v1494_v54, %v1255_v36  ;;  %v2464_v56 = vpop.f32.mrb[15].mxu1 }
 0xdb7   : > { %v1585_v58 = vpop.xlane.xlu0 %1584 }
 0xdb8   : > { %2565 = vrcp.f32 %v1585_v58 }
 0xdbb   : > { %v1743_v61 = vpop.permute.xlu0 %1742 }
 0xdc2   : > { %v2566_v59 = vpop.eup %2565 }
 0xdc3   : > { %v1587_v60 = vmul.f32 %v2566_v59, %v2564_v52 }
 0xdc5   : > { %2473 = vmatmul.mubr.msk.f32.vlgmr.msra.gmra.mrb[16].mxu1 %vm359_vm4, %v1587_v60 }
 0xdc6   : > { %2481 = vmatpush3.xpose.msk.msra.mxu1 %vm284_vm3, %v1745_v57  ;;  %2482 = vmatprep.mubr.msk.f32.mxu1 %vm2584_vm1, %v2583_v1 }
 0xdc7   : > { %2490 = vmatprep.subr.mxu1 %v2583_v1 }
 0xdc9   : > { %2483 = vmatmul.mubr.msk.f32.vlgmr.msra.gmra.mrb[18].mxu1 %vm284_vm3, %v1743_v61 }
 0xdca   : > { %2492 = vmatprep.mubr.msk.f32.mxu1 %vm2584_vm1, %v2583_v1  ;;  %2491 = vmatpush3.msk.msra.mxu1 %vm452_vm5, %v1907_v21 }
 0xdcb   : > { %2500 = vmatprep.subr.mxu1 %v2583_v1 }
 0xe98   : > { %v1660_v63 = vpop.f32.mrb[16].mxu1 }
 0xe99   : > { %v2474_v0 = vpop.f32.mrb[17].mxu1  ;;  %2478 = vmatmul.mubr.msk.f32.vlgmr.msra.gmra.mrb[18].mxu0 %vm284_vm3, %v1660_v63 }
 0xe9a   : > { %2487 = vmatprep.mubr.msk.f32.mxu0 %vm2584_vm1, %v2583_v1 }
 0xe9c   : > { %v1816_v5 = vpop.f32.mrb[18].mxu1 }
 0xe9d   : > { %v2484_v6 = vpop.f32.mrb[19].mxu1  ;;  %v1820_v7 = vsel %vm359_vm4, %v1816_v5, -inf }
 0xe9e   : > { %1821 = vmax.xlane.f32.xlu1 %v1820_v7 }
 0xeaf   : > { %1831 = vrot.lane.b32.xlu1 %v2665_v3, %s2604_s7 }
 0xeb3   : > { %1987 = vrot.lane.b32.xlu1 %v2668_v4, %s2605_s8 }
 0xeb7   : > { %1985 = vrot.lane.b32.xlu1 %v2668_v4, %s2606_s9 }
 0xf2b   : > { %v1822_v8 = vpop.xlane.xlu1 %1821 }
 0xf2c   : > { %v1823_v9 = vsub.f32 %v1816_v5, %v1822_v8 }
 0xf2e   : > { %v1824_v10 = vmul.f32 1.442695, %v1823_v9 }
 0xf2f   : > { %v1832_v11 = vpop.permute.xlu1 %1831 }
 0xf30   : > { %2567 = vpow2.f32 %v1824_v10  ;;  %2486 = vmatpush3.msra.mxu0 %v1832_v11 }
 0xf31   : > { %2495 = vmatprep.subr.mxu0 %v2583_v1 }
 0xf33   : > { %v1988_v19 = vpop.permute.xlu1 %1987 }
 0xf37   : > { %v1986_v20 = vpop.permute.xlu1 %1985 }
 0xf3a   : > { %v2568_v12 = vpop.eup %2567 }
 0xf3b   : > { %v1826_v13 = vsel %vm359_vm4, %v2568_v12, 0.0 }
 0xf3c   : > { %1827 = vadd.xlane.f32.xlu0 %v1826_v13 }
 0xf6c   : > { %v1737_v14 = vpop.f32.mrb[18].mxu0 }
 0xf6d   : > { %v1741_v15 = vadd.f32 %v1737_v14, %v1498_v55  ;;  %v2479_v16 = vpop.f32.mrb[19].mxu0 }
 0xfc9   : > { %v1828_v17 = vpop.xlane.xlu0 %1827 }
 0xfca   : > { %2569 = vrcp.f32 %v1828_v17 }
 0xfd4   : > { %v2570_v18 = vpop.eup %2569 }
 0xfd5   : > { %v1830_v4 = vmul.f32 %v2570_v18, %v2568_v12 }
 0xfd7   : > { %2488 = vmatmul.mubr.msk.f32.vlgmr.msra.gmra.mrb[20].mxu0 %vm359_vm4, %v1830_v4 }
 0xfd8   : > { %2496 = vmatpush3.xpose.msk.msra.mxu0 %vm284_vm3, %v1988_v19  ;;  %2497 = vmatprep.mubr.msk.f32.mxu0 %vm2584_vm1, %v2583_v1 }
 0xfd9   : > { %2505 = vmatprep.subr.mxu0 %v2583_v1 }
 0xfdb   : > { %2498 = vmatmul.mubr.msk.f32.vlgmr.msra.gmra.mrb[22].mxu0 %vm284_vm3, %v1986_v20 }
 0xfdc   : > { %2507 = vmatprep.mubr.msk.f32.mxu0 %vm2584_vm1, %v2583_v1 }
0x10aa   : > { %v1903_v22 = vpop.f32.mrb[20].mxu0 }
0x10ab   : > { %v2489_v23 = vpop.f32.mrb[21].mxu0  ;;  %2493 = vmatmul.mubr.msk.f32.vlgmr.msra.gmra.mrb[20].mxu1 %vm284_vm3, %v1903_v22 }
0x10ac   : > { %2502 = vmatprep.mubr.msk.f32.mxu1 %vm2584_vm1, %v2583_v1  ;;  %v2150_v1 = vld [vmem:[%s2855_s2 + $0xe] sm:$0x3] }
0x10ad   : > { %2506 = vmatpush3.msk.msra.mxu0 %vm452_vm5, %v2150_v1 }
0x10ae   : > { %v2059_v24 = vpop.f32.mrb[22].mxu0 }
0x10af   : > { %v2499_v25 = vpop.f32.mrb[23].mxu0  ;;  %v2063_v26 = vsel %vm359_vm4, %v2059_v24, -inf }
0x10b0   : > { %2064 = vmax.xlane.f32.xlu1 %v2063_v26 }
0x113d   : > { %v2065_v27 = vpop.xlane.xlu1 %2064 }
0x113e   : > { %v2066_v28 = vsub.f32 %v2059_v24, %v2065_v27 }
0x1140   : > { %v2067_v29 = vmul.f32 1.442695, %v2066_v28 }
0x1142   : > { %2571 = vpow2.f32 %v2067_v29 }
0x114c   : > { %v2572_v30 = vpop.eup %2571 }
0x114d   : > { %v2069_v31 = vsel %vm359_vm4, %v2572_v30, 0.0 }
0x114e   : > { %2070 = vadd.xlane.f32.xlu0 %v2069_v31 }
0x1164   : > { %2074 = vrot.lane.b32.xlu0 %v2665_v3, %s2607_s12 }
0x117e   : > { %v1980_v32 = vpop.f32.mrb[20].mxu1 }
0x117f   : > { %v1984_v33 = vadd.f32 %v1980_v32, %v1741_v15  ;;  %v2494_v34 = vpop.f32.mrb[21].mxu1 }
0x11db   : > { %v2071_v35 = vpop.xlane.xlu0 %2070 }
0x11dc   : > { %2573 = vrcp.f32 %v2071_v35 }
0x11df   : > { %v2075_v36 = vpop.permute.xlu0 %2074 }
0x11e0   : > { %2501 = vmatpush3.msra.mxu1 %v2075_v36 }
0x11e6   : > { %v2574_v37 = vpop.eup %2573 }
0x11e7   : > { %v2073_v38 = vmul.f32 %v2574_v37, %v2572_v30 }
0x11e9   : > { %2503 = vmatmul.mubr.msk.f32.vlgmr.msra.gmra.mrb[22].mxu1 %vm359_vm4, %v2073_v38 }
0x12bc   : > { %v2146_v39 = vpop.f32.mrb[22].mxu1 }
0x12bd   : > { %v2504_v3 = vpop.f32.mrb[23].mxu1  ;;  %2508 = vmatmul.mubr.msk.f32.vlgmr.msra.gmra.mrb[24].mxu0 %vm284_vm3, %v2146_v39 }
0x1390   : > { %v2223_v40 = vpop.f32.mrb[24].mxu0 }
0x1391   : > { %v2227_v41 = vadd.f32 %v2223_v40, %v1984_v33  ;;  %v2509_v42 = vpop.f32.mrb[25].mxu0 }
0x1393   : > { %v2228_v43 = vadd.f32 %v2227_v41, %v2659_v2 }
0x1395   : > { %2229 = vst.msk [vmem:[%s192_s20] sm:$0xff] %vm195_vm2, %v2228_v43 }
0x1396 PF: > { %s14_s15 = sadd.s32 1, %s2581_s15  }
0x1397   : > { %p11_p4 = scmp.ge.s32.totalorder %s14_s15, 4  }
0x1399   :  { %13 = sbr.rel (!%p11_p4) target bundleno = 1 (0x1), region = 66 }

</bundles_post_ra>
